<compile_context>
chip_gen: v6e
topology: v6e:2x2x1
jax: 0.10.0
libtpu: 0.0.40
codegen_flags: <defaults>
</compile_context>

<pallas_src>
import jax
import jax.numpy as jnp
from jax.experimental import pallas as pl
from jax.experimental.pallas import tpu as pltpu


def _round_up(n: int, m: int) -> int:
    return ((n + m - 1) // m) * m


def _mlp_encoder_kernel(x_ref, w1_ref, b1_ref, w2_ref, b2_ref, out_ref):
    # x_ref:  [TB, 125]   w1_ref: [125, Hp]   b1_ref: [1, Hp]
    # w2_ref: [Hp, L]     b2_ref: [1, L]      out_ref: [TB, L]
    # Rows are independent: garbage rows in a partial trailing block are safe
    # (their output rows are masked by the edge-block store).
    x = x_ref[...].astype(jnp.float32)

    # Linear 1 on the MXU, f32 accumulation.
    h = jnp.dot(x, w1_ref[...], preferred_element_type=jnp.float32) + b1_ref[...]

    # Exact (erf-based) GELU, matching torch.nn.GELU() default.
    h = 0.5 * h * (1.0 + jax.lax.erf(h * jnp.float32(0.7071067811865476)))

    # Linear 2 (output kept at true latent width; no padding).
    out = jnp.dot(h, w2_ref[...], preferred_element_type=jnp.float32) + b2_ref[...]
    out_ref[...] = out.astype(out_ref.dtype)


def prepare_encoder_params(w1, b1, w2, b2):
    """One-time weight preprocessing -- keep OUT of the per-call hot path.

    Takes PyTorch nn.Linear-layout params:
      w1: [hidden, 125], b1: [hidden], w2: [latent, hidden], b2: [latent]
    Returns transposed f32 params.  Only the hidden axis is zero-padded to a
    multiple of 128 (exact: padded columns give GELU(0)=0 and hit zero rows of
    w2t).  The contraction dim stays 125 and latent stays unpadded.
    """
    hidden, in_feat = w1.shape
    latent = w2.shape[0]
    h_pad = _round_up(hidden, 128)

    w1t = jnp.zeros((in_feat, h_pad), jnp.float32)
    w1t = w1t.at[:, :hidden].set(w1.T.astype(jnp.float32))
    b1r = jnp.zeros((1, h_pad), jnp.float32).at[:, :hidden].set(b1.astype(jnp.float32))

    w2t = jnp.zeros((h_pad, latent), jnp.float32)
    w2t = w2t.at[:hidden, :].set(w2.T.astype(jnp.float32))
    b2r = b2.astype(jnp.float32).reshape(1, latent)

    return {"w1t": w1t, "b1r": b1r, "w2t": w2t, "b2r": b2r}


def mlp_encoder_5x5x5(x, w1t, b1r, w2t, b2r, *, tb=2048):
    """x: [B, 5, 5, 5] (anything flattening to [B, 125]). Returns [B, latent] f32.

    w1t/b1r/w2t/b2r come from `prepare_encoder_params`.
    """
    B = x.shape[0]
    x_flat = x.reshape(B, -1)          # nn.Flatten(); no cast, no pad (cast in-kernel)
    in_feat = x_flat.shape[1]

    h_pad = w1t.shape[1]
    latent = w2t.shape[1]

    if B > 8:
        # Sublane-aligned tile, capped so the grid has >= 2 steps (engages the
        # second TensorCore on v7x via the "parallel" dimension semantics).
        tb_eff = min(tb, _round_up(pl.cdiv(B, 2), 8))
    else:
        # Tiny batch: a single block whose dims equal the full array dims.
        tb_eff = B

    grid = (pl.cdiv(B, tb_eff),)

    out = pl.pallas_call(
        _mlp_encoder_kernel,
        out_shape=jax.ShapeDtypeStruct((B, latent), jnp.float32),
        grid=grid,
        in_specs=[
            pl.BlockSpec((tb_eff, in_feat), lambda i: (i, 0)),  # x tile per step
            pl.BlockSpec((in_feat, h_pad), lambda i: (0, 0)),   # weights stay VMEM-resident
            pl.BlockSpec((1, h_pad), lambda i: (0, 0)),
            pl.BlockSpec((h_pad, latent), lambda i: (0, 0)),
            pl.BlockSpec((1, latent), lambda i: (0, 0)),
        ],
        out_specs=pl.BlockSpec((tb_eff, latent), lambda i: (i, 0)),
        compiler_params=pltpu.CompilerParams(
            dimension_semantics=("parallel",),
        ),
    )(x_flat, w1t, b1r, w2t, b2r)

    return out


def _init_params(key, latent_dim=16, hidden=512, in_feat=125):
    """Deterministic synthetic init mimicking nn.Linear default (uniform +/- 1/sqrt(fan_in))."""
    k1, k2, k3, k4 = jax.random.split(key, 4)
    lim1 = 1.0 / jnp.sqrt(in_feat)
    lim2 = 1.0 / jnp.sqrt(hidden)
    w1 = jax.random.uniform(k1, (hidden, in_feat), jnp.float32, -lim1, lim1)
    b1 = jax.random.uniform(k2, (hidden,), jnp.float32, -lim1, lim1)
    w2 = jax.random.uniform(k3, (latent_dim, hidden), jnp.float32, -lim2, lim2)
    b2 = jax.random.uniform(k4, (latent_dim,), jnp.float32, -lim2, lim2)
    return w1, b1, w2, b2


if __name__ == "__main__":
    key = jax.random.PRNGKey(0)
    kx, kp = jax.random.split(key)

    B, latent_dim, hidden = 8, 16, 512
    x = jax.random.normal(kx, (B, 5, 5, 5), jnp.float32)    # flattens to 125 features
    w1, b1, w2, b2 = _init_params(kp, latent_dim=latent_dim, hidden=hidden)

    # One-time weight preprocessing (hoisted out of the per-call path).
    params = prepare_encoder_params(w1, b1, w2, b2)

    fwd = jax.jit(mlp_encoder_5x5x5)
    out = fwd(x, params["w1t"], params["b1r"], params["w2t"], params["b2r"])
    out = jax.block_until_ready(out)

    # Pure-JAX reference with the ORIGINAL (unpadded) weights, exact GELU.
    xf = x.reshape(B, -1)
    h_ref = xf @ w1.T + b1
    h_ref = 0.5 * h_ref * (1.0 + jax.lax.erf(h_ref * jnp.float32(0.7071067811865476)))
    ref = h_ref @ w2.T + b2

    assert out.shape == (B, latent_dim)
    assert jnp.allclose(out, ref, atol=1e-4, rtol=1e-4)

    print("KERNEL_OK")
</pallas_src>

<mosaic_0001>
module attributes {stable_mosaic.version = 11 : i64} {
  func.func @_mlp_encoder_kernel(%arg0: i32, %arg1: memref<8x125xf32, #tpu.memory_space<vmem>>, %arg2: memref<125x512xf32, #tpu.memory_space<vmem>>, %arg3: memref<1x512xf32, #tpu.memory_space<vmem>>, %arg4: memref<512x16xf32, #tpu.memory_space<vmem>>, %arg5: memref<1x16xf32, #tpu.memory_space<vmem>>, %arg6: memref<8x16xf32, #tpu.memory_space<vmem>>) attributes {dimension_semantics = [#tpu.dimension_semantics<parallel>], iteration_bounds = array<i64: 1>, scalar_prefetch = 0 : i64, scratch_operands = 0 : i64, tpu.core_type = #tpu.core_type<tc>, window_params = [{transform_indices = @transform_0, window_bounds = array<i64: 8, 125>}, {pipeline_mode = #tpu.pipeline_mode<synchronous>, transform_indices = @transform_1, window_bounds = array<i64: 125, 512>}, {pipeline_mode = #tpu.pipeline_mode<synchronous>, transform_indices = @transform_2, window_bounds = array<i64: 1, 512>}, {pipeline_mode = #tpu.pipeline_mode<synchronous>, transform_indices = @transform_3, window_bounds = array<i64: 512, 16>}, {pipeline_mode = #tpu.pipeline_mode<synchronous>, transform_indices = @transform_4, window_bounds = array<i64: 1, 16>}, {transform_indices = @transform_5, window_bounds = array<i64: 8, 16>}]} {
    %c0 = arith.constant 0 : index
    %c0_0 = arith.constant 0 : index
    %0 = vector.load %arg1[%c0, %c0_0] : memref<8x125xf32, #tpu.memory_space<vmem>>, vector<8x125xf32>
    %c0_1 = arith.constant 0 : index
    %c0_2 = arith.constant 0 : index
    %1 = vector.load %arg2[%c0_1, %c0_2] : memref<125x512xf32, #tpu.memory_space<vmem>>, vector<125x512xf32>
    %cst = arith.constant dense<0.000000e+00> : vector<8x512xf32>
    %2 = tpu.matmul %0, %1, %cst {dimension_numbers = #tpu.dot_dimension_numbers<[1], [0], [0], [1], [0, 0, 1, 1], [], []>} : vector<8x125xf32>, vector<125x512xf32>, vector<8x512xf32> -> vector<8x512xf32>
    %c0_3 = arith.constant 0 : index
    %c0_4 = arith.constant 0 : index
    %3 = vector.load %arg3[%c0_3, %c0_4] : memref<1x512xf32, #tpu.memory_space<vmem>>, vector<1x512xf32>
    %4 = vector.broadcast %3 : vector<1x512xf32> to vector<8x512xf32>
    %5 = arith.addf %2, %4 : vector<8x512xf32>
    %cst_5 = arith.constant 5.000000e-01 : f32
    %6 = vector.broadcast %cst_5 : f32 to vector<8x512xf32>
    %7 = arith.mulf %6, %5 : vector<8x512xf32>
    %cst_6 = arith.constant 0.707106769 : f32
    %8 = vector.broadcast %cst_6 : f32 to vector<8x512xf32>
    %9 = arith.mulf %5, %8 : vector<8x512xf32>
    %10 = math.erf %9 : vector<8x512xf32>
    %cst_7 = arith.constant 1.000000e+00 : f32
    %11 = vector.broadcast %cst_7 : f32 to vector<8x512xf32>
    %12 = arith.addf %11, %10 : vector<8x512xf32>
    %13 = arith.mulf %7, %12 : vector<8x512xf32>
    %c0_8 = arith.constant 0 : index
    %c0_9 = arith.constant 0 : index
    %14 = vector.load %arg4[%c0_8, %c0_9] : memref<512x16xf32, #tpu.memory_space<vmem>>, vector<512x16xf32>
    %cst_10 = arith.constant dense<0.000000e+00> : vector<8x16xf32>
    %15 = tpu.matmul %13, %14, %cst_10 {dimension_numbers = #tpu.dot_dimension_numbers<[1], [0], [0], [1], [0, 0, 1, 1], [], []>} : vector<8x512xf32>, vector<512x16xf32>, vector<8x16xf32> -> vector<8x16xf32>
    %c0_11 = arith.constant 0 : index
    %c0_12 = arith.constant 0 : index
    %16 = vector.load %arg5[%c0_11, %c0_12] : memref<1x16xf32, #tpu.memory_space<vmem>>, vector<1x16xf32>
    %17 = vector.broadcast %16 : vector<1x16xf32> to vector<8x16xf32>
    %18 = arith.addf %15, %17 : vector<8x16xf32>
    %c0_13 = arith.constant 0 : index
    %c0_14 = arith.constant 0 : index
    %19 = vector.load %arg6[%c0_13, %c0_14] : memref<8x16xf32, #tpu.memory_space<vmem>>, vector<8x16xf32>
    tpu.vector_store %arg6[%c0_13, %c0_14], %18 {strides = array<i32>} : memref<8x16xf32, #tpu.memory_space<vmem>>, vector<8x16xf32>,
    return
  }
  func.func @transform_0(%arg0: i32) -> (i32, i32) {
    %c0_i32 = arith.constant 0 : i32
    %c0_i32_0 = arith.constant 0 : i32
    return %arg0, %c0_i32 : i32, i32
  }
  func.func @transform_1(%arg0: i32) -> (i32, i32) {
    %c0_i32 = arith.constant 0 : i32
    %c0_i32_0 = arith.constant 0 : i32
    %c0_i32_1 = arith.constant 0 : i32
    return %c0_i32, %c0_i32_0 : i32, i32
  }
  func.func @transform_2(%arg0: i32) -> (i32, i32) {
    %c0_i32 = arith.constant 0 : i32
    %c0_i32_0 = arith.constant 0 : i32
    %c0_i32_1 = arith.constant 0 : i32
    return %c0_i32, %c0_i32_0 : i32, i32
  }
  func.func @transform_3(%arg0: i32) -> (i32, i32) {
    %c0_i32 = arith.constant 0 : i32
    %c0_i32_0 = arith.constant 0 : i32
    %c0_i32_1 = arith.constant 0 : i32
    return %c0_i32, %c0_i32_0 : i32, i32
  }
  func.func @transform_4(%arg0: i32) -> (i32, i32) {
    %c0_i32 = arith.constant 0 : i32
    %c0_i32_0 = arith.constant 0 : i32
    %c0_i32_1 = arith.constant 0 : i32
    return %c0_i32, %c0_i32_0 : i32, i32
  }
  func.func @transform_5(%arg0: i32) -> (i32, i32) {
    %c0_i32 = arith.constant 0 : i32
    %c0_i32_0 = arith.constant 0 : i32
    return %arg0, %c0_i32 : i32, i32
  }
}

</mosaic_0001>

<bundles_post_ra>
// kernel: mlp_encoder_5x5x5.1
= control target key start
LH: loop header
LB: loop body
LE: loop exit
PB: predicated region body
PF: predicated region fallthrough
CT: control target
= control target key end

     0   :  { %vm112_vm0 = vcmask 1044480   ;;  %s1051_s0 = inlined_call_operand.vmem [shape: f32[8,125], index: 0, kind: input, shape index: {}]   ;;  %s1052_s1 = inlined_call_operand.vmem [shape: f32[125,512], index: 1, kind: input, shape index: {}]   ;;  %s1053_s2 = inlined_call_operand.vmem [shape: f32[1,512], index: 2, kind: input, shape index: {}]   ;;  %s1054_s3 = inlined_call_operand.vmem [shape: f32[512,16], index: 3, kind: input, shape index: {}]   ;;  %s1055_s4 = inlined_call_operand.vmem [shape: f32[1,16], index: 4, kind: input, shape index: {}]   ;;  %s1056_s5 = inlined_call_operand.hbm [shape: f32[8,16], index: 5, kind: output, shape index: {}]  }
   0x1   :  { %v83_v0 = vld [vmem:[%s1052_s1 + $0x1e8] sm:$0x1f]  ;;  %v85_v1 = vld [vmem:[%s1052_s1 + $0x1f8] sm:$0x1f]  ;;  %v82_v3 = vld [vmem:[%s1052_s1 + $0x1e0] sm:$0x1f] }
   0x2   :  { %v79_v2 = vld [vmem:[%s1052_s1 + $0x1c8] sm:$0xff]  ;;  %514 = vmatprep.subr.msk.mxu0 %vm112_vm0, %v83_v0  ;;  %517 = vmatprep.subr.msk.mxu1 %vm112_vm0, %v85_v1  ;;  %v84_v4 = vld [vmem:[%s1052_s1 + $0x1f0] sm:$0x1f]  ;;  %v81_v5 = vld [vmem:[%s1052_s1 + $0x1d8] sm:$0xff] }
   0x3   :  { %515 = vmatpush1.msk.msra.mxu0 %vm112_vm0, %v82_v3  ;;  %518 = vmatpush1.msk.msra.mxu1 %vm112_vm0, %v84_v4  ;;  %v78_v6 = vld [vmem:[%s1052_s1 + $0x1c0] sm:$0xff]  ;;  %v80_v7 = vld [vmem:[%s1052_s1 + $0x1d0] sm:$0xff]  ;;  %v75_v8 = vld [vmem:[%s1052_s1 + $0x1a8] sm:$0xff] }
   0x4   :  { %127 = vmatprep.subr.mxu0 %v79_v2  ;;  %198 = vmatprep.subr.mxu1 %v81_v5  ;;  %v77_v9 = vld [vmem:[%s1052_s1 + $0x1b8] sm:$0xff]  ;;  %v74_v10 = vld [vmem:[%s1052_s1 + $0x1a0] sm:$0xff]  ;;  %v76_v11 = vld [vmem:[%s1052_s1 + $0x1b0] sm:$0xff] }
   0x5   :  { %128 = vmatpush1.msra.mxu0 %v78_v6  ;;  %199 = vmatpush1.msra.mxu1 %v80_v7  ;;  %v71_v12 = vld [vmem:[%s1052_s1 + $0x188] sm:$0xff]  ;;  %v73_v13 = vld [vmem:[%s1052_s1 + $0x198] sm:$0xff]  ;;  %v70_v14 = vld [vmem:[%s1052_s1 + $0x180] sm:$0xff] }
   0x6   :  { %129 = vmatprep.subr.mxu0 %v75_v8  ;;  %200 = vmatprep.subr.mxu1 %v77_v9  ;;  %v72_v15 = vld [vmem:[%s1052_s1 + $0x190] sm:$0xff]  ;;  %v67_v16 = vld [vmem:[%s1052_s1 + $0x168] sm:$0xff]  ;;  %v69_v17 = vld [vmem:[%s1052_s1 + $0x178] sm:$0xff] }
   0x7   :  { %130 = vmatpush1.msra.mxu0 %v74_v10  ;;  %201 = vmatpush1.msra.mxu1 %v76_v11  ;;  %v66_v18 = vld [vmem:[%s1052_s1 + $0x160] sm:$0xff]  ;;  %v68_v19 = vld [vmem:[%s1052_s1 + $0x170] sm:$0xff]  ;;  %v63_v20 = vld [vmem:[%s1052_s1 + $0x148] sm:$0xff] }
   0x8   :  { %131 = vmatprep.subr.mxu0 %v71_v12  ;;  %202 = vmatprep.subr.mxu1 %v73_v13  ;;  %v65_v21 = vld [vmem:[%s1052_s1 + $0x158] sm:$0xff]  ;;  %v62_v22 = vld [vmem:[%s1052_s1 + $0x140] sm:$0xff]  ;;  %v64_v23 = vld [vmem:[%s1052_s1 + $0x150] sm:$0xff] }
   0x9   :  { %132 = vmatpush1.msra.mxu0 %v70_v14  ;;  %203 = vmatpush1.msra.mxu1 %v72_v15  ;;  %v59_v24 = vld [vmem:[%s1052_s1 + $0x128] sm:$0xff]  ;;  %v61_v25 = vld [vmem:[%s1052_s1 + $0x138] sm:$0xff]  ;;  %v58_v26 = vld [vmem:[%s1052_s1 + $0x120] sm:$0xff] }
   0xa   :  { %133 = vmatprep.subr.mxu0 %v67_v16  ;;  %204 = vmatprep.subr.mxu1 %v69_v17  ;;  %v60_v27 = vld [vmem:[%s1052_s1 + $0x130] sm:$0xff]  ;;  %v55_v28 = vld [vmem:[%s1052_s1 + $0x108] sm:$0xff]  ;;  %v57_v29 = vld [vmem:[%s1052_s1 + $0x118] sm:$0xff] }
   0xb   :  { %134 = vmatpush1.msra.mxu0 %v66_v18  ;;  %205 = vmatpush1.msra.mxu1 %v68_v19  ;;  %v54_v30 = vld [vmem:[%s1052_s1 + $0x100] sm:$0xff]  ;;  %v56_v31 = vld [vmem:[%s1052_s1 + $0x110] sm:$0xff]  ;;  %v51_v32 = vld [vmem:[%s1052_s1 + $0xe8] sm:$0xff] }
   0xc   :  { %135 = vmatprep.subr.mxu0 %v63_v20  ;;  %206 = vmatprep.subr.mxu1 %v65_v21  ;;  %v53_v33 = vld [vmem:[%s1052_s1 + $0xf8] sm:$0xff]  ;;  %v50_v34 = vld [vmem:[%s1052_s1 + $0xe0] sm:$0xff]  ;;  %v52_v35 = vld [vmem:[%s1052_s1 + $0xf0] sm:$0xff] }
   0xd   :  { %136 = vmatpush1.msra.mxu0 %v62_v22  ;;  %207 = vmatpush1.msra.mxu1 %v64_v23  ;;  %v47_v36 = vld [vmem:[%s1052_s1 + $0xc8] sm:$0xff]  ;;  %v49_v37 = vld [vmem:[%s1052_s1 + $0xd8] sm:$0xff]  ;;  %v46_v38 = vld [vmem:[%s1052_s1 + $0xc0] sm:$0xff] }
   0xe   :  { %137 = vmatprep.subr.mxu0 %v59_v24  ;;  %208 = vmatprep.subr.mxu1 %v61_v25  ;;  %v48_v39 = vld [vmem:[%s1052_s1 + $0xd0] sm:$0xff]  ;;  %v43_v40 = vld [vmem:[%s1052_s1 + $0xa8] sm:$0xff]  ;;  %v45_v41 = vld [vmem:[%s1052_s1 + $0xb8] sm:$0xff] }
   0xf   :  { %138 = vmatpush1.msra.mxu0 %v58_v26  ;;  %209 = vmatpush1.msra.mxu1 %v60_v27  ;;  %v42_v42 = vld [vmem:[%s1052_s1 + $0xa0] sm:$0xff]  ;;  %v44_v43 = vld [vmem:[%s1052_s1 + $0xb0] sm:$0xff]  ;;  %v39_v44 = vld [vmem:[%s1052_s1 + $0x88] sm:$0xff] }
  0x10   :  { %139 = vmatprep.subr.mxu0 %v55_v28  ;;  %210 = vmatprep.subr.mxu1 %v57_v29  ;;  %v41_v45 = vld [vmem:[%s1052_s1 + $0x98] sm:$0xff]  ;;  %v38_v46 = vld [vmem:[%s1052_s1 + $0x80] sm:$0xff]  ;;  %v40_v47 = vld [vmem:[%s1052_s1 + $0x90] sm:$0xff] }
  0x11   :  { %140 = vmatpush1.msra.mxu0 %v54_v30  ;;  %211 = vmatpush1.msra.mxu1 %v56_v31  ;;  %v35_v48 = vld [vmem:[%s1052_s1 + $0x68] sm:$0xff]  ;;  %v37_v49 = vld [vmem:[%s1052_s1 + $0x78] sm:$0xff]  ;;  %v34_v50 = vld [vmem:[%s1052_s1 + $0x60] sm:$0xff] }
  0x12   :  { %141 = vmatprep.subr.mxu0 %v51_v32  ;;  %212 = vmatprep.subr.mxu1 %v53_v33  ;;  %v36_v51 = vld [vmem:[%s1052_s1 + $0x70] sm:$0xff]  ;;  %v31_v52 = vld [vmem:[%s1052_s1 + $0x48] sm:$0xff]  ;;  %v33_v53 = vld [vmem:[%s1052_s1 + $0x58] sm:$0xff] }
  0x13   :  { %142 = vmatpush1.msra.mxu0 %v50_v34  ;;  %213 = vmatpush1.msra.mxu1 %v52_v35  ;;  %v30_v54 = vld [vmem:[%s1052_s1 + $0x40] sm:$0xff]  ;;  %v32_v55 = vld [vmem:[%s1052_s1 + $0x50] sm:$0xff]  ;;  %v27_v56 = vld [vmem:[%s1052_s1 + $0x28] sm:$0xff] }
  0x14   :  { %143 = vmatprep.subr.mxu0 %v47_v36  ;;  %214 = vmatprep.subr.mxu1 %v49_v37  ;;  %v29_v57 = vld [vmem:[%s1052_s1 + $0x38] sm:$0xff] }
  0x15   :  { %144 = vmatpush1.msra.mxu0 %v46_v38  ;;  %215 = vmatpush1.msra.mxu1 %v48_v39 }
  0x16   :  { %145 = vmatprep.subr.mxu0 %v43_v40  ;;  %216 = vmatprep.subr.mxu1 %v45_v41 }
  0x17   :  { %146 = vmatpush1.msra.mxu0 %v42_v42  ;;  %217 = vmatpush1.msra.mxu1 %v44_v43 }
  0x18   :  { %147 = vmatprep.subr.mxu0 %v39_v44  ;;  %218 = vmatprep.subr.mxu1 %v41_v45 }
  0x19   :  { %148 = vmatpush1.msra.mxu0 %v38_v46  ;;  %219 = vmatpush1.msra.mxu1 %v40_v47 }
  0x1a   :  { %149 = vmatprep.subr.mxu0 %v35_v48  ;;  %220 = vmatprep.subr.mxu1 %v37_v49 }
  0x1b   :  { %150 = vmatpush1.msra.mxu0 %v34_v50  ;;  %221 = vmatpush1.msra.mxu1 %v36_v51 }
  0x1c   :  { %10 = vsyncpa [#allocation3], 0  ;;  %151 = vmatprep.subr.mxu0 %v31_v52  ;;  %222 = vmatprep.subr.mxu1 %v33_v53  ;;  %v26_v58 = vld [vmem:[%s1052_s1 + $0x20] sm:$0xff]  ;;  %v28_v59 = vld [vmem:[%s1052_s1 + $0x30] sm:$0xff]  ;;  %vm108_vm1 = vcmask 1022976   ;;  %v623_v1 = vmov 0.0  }
  0x1d   :  { %152 = vmatpush1.msra.mxu0 %v30_v54  ;;  %223 = vmatpush1.msra.mxu1 %v32_v55  ;;  %v23_v60 = vld [vmem:[%s1052_s1 + $0x8] sm:$0xff]  ;;  %v25_v61 = vld [vmem:[%s1052_s1 + $0x18] sm:$0xff]  ;;  %v22_v62 = vld [vmem:[%s1052_s1] sm:$0xff]  ;;  %s624_s18 = smov [#allocation2]   ;;  %vm498_vm2 = vcmask 130048  }
  0x1e   :  { %153 = vmatprep.subr.mxu0 %v27_v56  ;;  %224 = vmatprep.subr.mxu1 %v29_v57  ;;  %v24_v63 = vld [vmem:[%s1052_s1 + $0x10] sm:$0xff]  ;;  %v21_v0 = vld [vmem:[%s1051_s0] sm:$0xff]  ;;  %v318_v2 = vld [vmem:[%s1054_s3 + $0xf8] sm:$0xff]  ;;  %s506_s19 = sshll.u32 %s624_s18, 4  ;;  %s507_s19 = int_to_ptr.vmem [resolvable:$true] %s506_s19 }
  0x1f   :  { %154 = vmatpush1.msra.mxu0 %v26_v58  ;;  %225 = vmatpush1.msra.mxu1 %v28_v59  ;;  %v350_v3 = vld [vmem:[%s1054_s3 + $0x1f8] sm:$0xff]  ;;  %v317_v6 = vld [vmem:[%s1054_s3 + $0xf0] sm:$0xff]  ;;  %v316_v10 = vld [vmem:[%s1054_s3 + $0xe8] sm:$0xff]  ;;  %s601_s20 = scalar_lea.vmem %s507_s19, 128  ;;  %p606_p1 = scmp.lt.s32.totalorder %s507_s19, %s507_s19 }
  0x20   :  { %155 = vmatprep.subr.mxu0 %v23_v60  ;;  %226 = vmatprep.subr.mxu1 %v25_v61  ;;  %v302_v4 = vld [vmem:[%s1054_s3 + $0x78] sm:$0xff]  ;;  %v349_v7 = vld [vmem:[%s1054_s3 + $0x1f0] sm:$0xff]  ;;  %v348_v11 = vld [vmem:[%s1054_s3 + $0x1e8] sm:$0xff]  ;;  %p602_p0 = scmp.ne.s32.totalorder %s507_s19, %s601_s20  ;;  %p607_p2 = scmp.lt.s32.totalorder %s601_s20, %s601_s20 }
  0x21   :  { %156 = vmatpush1.msra.mxu0 %v22_v62  ;;  %189 = vmatprep.mubr.f32.mxu0 %v623_v1  ;;  %v334_v5 = vld [vmem:[%s1054_s3 + $0x178] sm:$0xff]  ;;  %v301_v8 = vld [vmem:[%s1054_s3 + $0x70] sm:$0xff]  ;;  %v300_v12 = vld [vmem:[%s1054_s3 + $0x68] sm:$0xff] }
  0x22   :  { %227 = vmatpush1.msra.mxu1 %v24_v63  ;;  %260 = vmatprep.mubr.f32.mxu1 %v623_v1  ;;  %v333_v9 = vld [vmem:[%s1054_s3 + $0x170] sm:$0xff]  ;;  %v332_v13 = vld [vmem:[%s1054_s3 + $0x168] sm:$0xff]  ;;  %v315_v14 = vld [vmem:[%s1054_s3 + $0xe0] sm:$0xff]  ;;  %p608_p3 = por %p607_p2, %p606_p1 }
  0x23   :  { %516 = vmatmul.mubr.msk.f32.vlgmr.msra.gmra.mxu0 %vm108_vm1, %v21_v0  ;;  %519 = vmatmul.mubr.msk.f32.vlgmr.msra.gmra.mxu1 %vm108_vm1, %v21_v0  ;;  %v347_v15 = vld [vmem:[%s1054_s3 + $0x1e0] sm:$0xff]  ;;  %v314_v18 = vld [vmem:[%s1054_s3 + $0xd8] sm:$0xff]  ;;  %v313_v22 = vld [vmem:[%s1054_s3 + $0xd0] sm:$0xff] }
  0x24   :  { %521 = vmatprep.subr.mxu0 %v318_v2  ;;  %556 = vmatprep.subr.mxu1 %v350_v3  ;;  %v299_v16 = vld [vmem:[%s1054_s3 + $0x60] sm:$0xff]  ;;  %v346_v19 = vld [vmem:[%s1054_s3 + $0x1d8] sm:$0xff]  ;;  %v345_v23 = vld [vmem:[%s1054_s3 + $0x1d0] sm:$0xff]  ;;  %v88_v2 = vlaneseq  ;;  %p609_p4 = pnand %p608_p3, %p602_p0 }
  0x25   :  { %522 = vmatpush3.msra.mxu0 %v302_v4  ;;  %557 = vmatpush3.msra.mxu1 %v334_v5  ;;  %v331_v17 = vld [vmem:[%s1054_s3 + $0x160] sm:$0xff]  ;;  %v298_v20 = vld [vmem:[%s1054_s3 + $0x58] sm:$0xff]  ;;  %v297_v24 = vld [vmem:[%s1054_s3 + $0x50] sm:$0xff] }
  0x26   :  { %523 = vmatprep.subr.mxu0 %v317_v6  ;;  %558 = vmatprep.subr.mxu1 %v349_v7  ;;  %v330_v21 = vld [vmem:[%s1054_s3 + $0x158] sm:$0xff]  ;;  %v329_v25 = vld [vmem:[%s1054_s3 + $0x150] sm:$0xff]  ;;  %v312_v26 = vld [vmem:[%s1054_s3 + $0xc8] sm:$0xff]  ;;  %v89_v3 = vshrl.u32 %v88_v2, 7 }
  0x27   :  { %524 = vmatpush3.msra.mxu0 %v301_v8  ;;  %559 = vmatpush3.msra.mxu1 %v333_v9  ;;  %v344_v27 = vld [vmem:[%s1054_s3 + $0x1c8] sm:$0xff]  ;;  %v311_v30 = vld [vmem:[%s1054_s3 + $0xc0] sm:$0xff]  ;;  %v310_v34 = vld [vmem:[%s1054_s3 + $0xb8] sm:$0xff] }
  0x28   :  { %525 = vmatprep.subr.mxu0 %v316_v10  ;;  %560 = vmatprep.subr.mxu1 %v348_v11  ;;  %v296_v28 = vld [vmem:[%s1054_s3 + $0x48] sm:$0xff]  ;;  %v343_v31 = vld [vmem:[%s1054_s3 + $0x1c0] sm:$0xff]  ;;  %v342_v35 = vld [vmem:[%s1054_s3 + $0x1b8] sm:$0xff]  ;;  %v90_v4 = vsub.s32 0, %v89_v3  ;;  %v98_v5 = vsub.s32 2, %v89_v3  ;;  %v94_v7 = vsub.s32 1, %v89_v3 }
  0x29   :  { %526 = vmatpush3.msra.mxu0 %v300_v12  ;;  %561 = vmatpush3.msra.mxu1 %v332_v13  ;;  %v328_v29 = vld [vmem:[%s1054_s3 + $0x148] sm:$0xff]  ;;  %v295_v32 = vld [vmem:[%s1054_s3 + $0x40] sm:$0xff]  ;;  %v294_v36 = vld [vmem:[%s1054_s3 + $0x38] sm:$0xff]  ;;  %v102_v8 = vsub.s32 3, %v89_v3 }
  0x2a   :  { %527 = vmatprep.subr.mxu0 %v315_v14  ;;  %562 = vmatprep.subr.mxu1 %v347_v15  ;;  %v327_v33 = vld [vmem:[%s1054_s3 + $0x140] sm:$0xff]  ;;  %v326_v37 = vld [vmem:[%s1054_s3 + $0x138] sm:$0xff]  ;;  %v309_v38 = vld [vmem:[%s1054_s3 + $0xb0] sm:$0xff] }
  0x2b   :  { %528 = vmatpush3.msra.mxu0 %v299_v16  ;;  %563 = vmatpush3.msra.mxu1 %v331_v17  ;;  %v341_v39 = vld [vmem:[%s1054_s3 + $0x1b0] sm:$0xff]  ;;  %v308_v42 = vld [vmem:[%s1054_s3 + $0xa8] sm:$0xff]  ;;  %v307_v46 = vld [vmem:[%s1054_s3 + $0xa0] sm:$0xff] }
  0x2c   :  { %529 = vmatprep.subr.mxu0 %v314_v18  ;;  %564 = vmatprep.subr.mxu1 %v346_v19  ;;  %v293_v40 = vld [vmem:[%s1054_s3 + $0x30] sm:$0xff]  ;;  %v340_v43 = vld [vmem:[%s1054_s3 + $0x1a8] sm:$0xff]  ;;  %v339_v47 = vld [vmem:[%s1054_s3 + $0x1a0] sm:$0xff] }
  0x2d   :  { %530 = vmatpush3.msra.mxu0 %v298_v20  ;;  %565 = vmatpush3.msra.mxu1 %v330_v21  ;;  %v325_v41 = vld [vmem:[%s1054_s3 + $0x130] sm:$0xff]  ;;  %v292_v44 = vld [vmem:[%s1054_s3 + $0x28] sm:$0xff]  ;;  %v291_v48 = vld [vmem:[%s1054_s3 + $0x20] sm:$0xff] }
  0x2e   :  { %531 = vmatprep.subr.mxu0 %v313_v22  ;;  %566 = vmatprep.subr.mxu1 %v345_v23  ;;  %v324_v45 = vld [vmem:[%s1054_s3 + $0x128] sm:$0xff]  ;;  %v323_v49 = vld [vmem:[%s1054_s3 + $0x120] sm:$0xff]  ;;  %v306_v50 = vld [vmem:[%s1054_s3 + $0x98] sm:$0xff] }
  0x2f   :  { %532 = vmatpush3.msra.mxu0 %v297_v24  ;;  %567 = vmatpush3.msra.mxu1 %v329_v25  ;;  %v338_v51 = vld [vmem:[%s1054_s3 + $0x198] sm:$0xff]  ;;  %v305_v54 = vld [vmem:[%s1054_s3 + $0x90] sm:$0xff]  ;;  %v304_v58 = vld [vmem:[%s1054_s3 + $0x88] sm:$0xff] }
  0x30   :  { %533 = vmatprep.subr.mxu0 %v312_v26  ;;  %568 = vmatprep.subr.mxu1 %v344_v27  ;;  %v290_v52 = vld [vmem:[%s1054_s3 + $0x18] sm:$0xff]  ;;  %v337_v55 = vld [vmem:[%s1054_s3 + $0x190] sm:$0xff]  ;;  %v336_v59 = vld [vmem:[%s1054_s3 + $0x188] sm:$0xff] }
  0x31   :  { %534 = vmatpush3.msra.mxu0 %v296_v28  ;;  %569 = vmatpush3.msra.mxu1 %v328_v29  ;;  %v322_v53 = vld [vmem:[%s1054_s3 + $0x118] sm:$0xff]  ;;  %v289_v56 = vld [vmem:[%s1054_s3 + $0x10] sm:$0xff]  ;;  %v288_v60 = vld [vmem:[%s1054_s3 + $0x8] sm:$0xff] }
  0x32   :  { %535 = vmatprep.subr.mxu0 %v311_v30  ;;  %570 = vmatprep.subr.mxu1 %v343_v31  ;;  %v321_v57 = vld [vmem:[%s1054_s3 + $0x110] sm:$0xff]  ;;  %v320_v61 = vld [vmem:[%s1054_s3 + $0x108] sm:$0xff]  ;;  %v303_v62 = vld [vmem:[%s1054_s3 + $0x80] sm:$0xff] }
  0x33   :  { %536 = vmatpush3.msra.mxu0 %v295_v32  ;;  %571 = vmatpush3.msra.mxu1 %v327_v33  ;;  %v335_v63 = vld [vmem:[%s1054_s3 + $0x180] sm:$0xff] }
  0x34   :  { %537 = vmatprep.subr.mxu0 %v310_v34  ;;  %572 = vmatprep.subr.mxu1 %v342_v35  ;;  %v287_v0 = vld [vmem:[%s1054_s3] sm:$0xff] }
  0x35   :  { %538 = vmatpush3.msra.mxu0 %v294_v36  ;;  %573 = vmatpush3.msra.mxu1 %v326_v37  ;;  %v319_v1 = vld [vmem:[%s1054_s3 + $0x100] sm:$0xff] }
  0x36   :  { %539 = vmatprep.subr.mxu0 %v309_v38  ;;  %574 = vmatprep.subr.mxu1 %v341_v39  ;;  %v86_v6 = vld [vmem:[%s1053_s2] sm:$0xf] }
  0x37   :  { %540 = vmatpush3.msra.mxu0 %v293_v40  ;;  %575 = vmatpush3.msra.mxu1 %v325_v41  ;;  %v91_v9 = vrot.slane %v86_v6, %v90_v4  ;;  %v99_v10 = vrot.slane %v86_v6, %v98_v5  ;;  %v95_v13 = vrot.slane %v86_v6, %v94_v7 }
  0x38   :  { %541 = vmatprep.subr.mxu0 %v308_v42  ;;  %576 = vmatprep.subr.mxu1 %v340_v43  ;;  %v103_v14 = vrot.slane %v86_v6, %v102_v8  ;;  %v520_v43 = vld [vmem:[%s1055_s4] ss:$0 sm:$0xff] }
  0x39   :  { %542 = vmatpush3.msra.mxu0 %v292_v44  ;;  %577 = vmatpush3.msra.mxu1 %v324_v45 }
  0x3a   :  { %543 = vmatprep.subr.mxu0 %v307_v46  ;;  %578 = vmatprep.subr.mxu1 %v339_v47 }
  0x3b   :  { %544 = vmatpush3.msra.mxu0 %v291_v48  ;;  %579 = vmatpush3.msra.mxu1 %v323_v49 }
  0x3c   :  { %545 = vmatprep.subr.mxu0 %v306_v50  ;;  %580 = vmatprep.subr.mxu1 %v338_v51 }
  0x3d   :  { %546 = vmatpush3.msra.mxu0 %v290_v52  ;;  %581 = vmatpush3.msra.mxu1 %v322_v53 }
  0x3e   :  { %547 = vmatprep.subr.mxu0 %v305_v54  ;;  %582 = vmatprep.subr.mxu1 %v337_v55 }
  0x3f   :  { %548 = vmatpush3.msra.mxu0 %v289_v56  ;;  %583 = vmatpush3.msra.mxu1 %v321_v57 }
  0x40   :  { %549 = vmatprep.subr.mxu0 %v304_v58  ;;  %584 = vmatprep.subr.mxu1 %v336_v59 }
  0x41   :  { %550 = vmatpush3.msra.mxu0 %v288_v60  ;;  %585 = vmatpush3.msra.mxu1 %v320_v61 }
  0x42   :  { %551 = vmatprep.subr.mxu0 %v303_v62  ;;  %586 = vmatprep.subr.mxu1 %v335_v63 }
  0x43   :  { %552 = vmatpush3.msra.mxu0 %v287_v0  ;;  %587 = vmatpush3.msra.mxu1 %v319_v1 }
  0xe3   :  { %v191_v11 = vpop.f32.mrf.mxu0  ;;  %v262_v12 = vpop.f32.mrf.mxu1 }
  0xe4   :  { %v192_v15 = vadd.f32 %v191_v11, %v91_v9  ;;  %v263_v16 = vadd.f32 %v262_v12, %v99_v10 }
  0xe5   :  { %v193_v17 = vpop.f32.mrf.mxu0  ;;  %v264_v18 = vpop.f32.mrf.mxu1 }
  0xe6   :  { %v271_v19 = vmul.f32 0.70710677, %v192_v15  ;;  %v273_v20 = vmul.f32 0.70710677, %v263_v16  ;;  %v194_v21 = vadd.f32 %v193_v17, %v95_v13  ;;  %v265_v22 = vadd.f32 %v264_v18, %v103_v14 }
  0xe7   :  { %v267_v33 = vmul.f32 0.5, %v192_v15  ;;  %v269_v36 = vmul.f32 0.5, %v263_v16 }
  0xe8   :  { %593 = verf.f32 %v271_v19  ;;  %v272_v23 = vmul.f32 0.70710677, %v194_v21  ;;  %v274_v24 = vmul.f32 0.70710677, %v265_v22  ;;  %v268_v31 = vmul.f32 0.5, %v194_v21 }
  0xe9   :  { %595 = verf.f32 %v273_v20  ;;  %v270_v34 = vmul.f32 0.5, %v265_v22 }
  0xea   :  { %597 = verf.f32 %v272_v23 }
  0xeb   :  { %599 = verf.f32 %v274_v24 }
  0xf5   :  { %v594_v25 = vpop.eup %593 }
  0xf6   :  { %v596_v26 = vpop.eup %595  ;;  %v279_v28 = vadd.f32 1.0, %v594_v25 }
  0xf7   :  { %v598_v27 = vpop.eup %597  ;;  %v281_v30 = vadd.f32 1.0, %v596_v26 }
  0xf8   :  { %v600_v29 = vpop.eup %599  ;;  %v280_v32 = vadd.f32 1.0, %v598_v27  ;;  %v283_v38 = vmul.f32 %v279_v28, %v267_v33 }
  0xf9   :  { %v282_v35 = vadd.f32 1.0, %v600_v29  ;;  %v285_v40 = vmul.f32 %v281_v30, %v269_v36 }
  0xfa   :  { %v284_v37 = vmul.f32 %v280_v32, %v268_v31 }
  0xfb   :  { %v286_v39 = vmul.f32 %v282_v35, %v270_v34 }
  0xfc   :  { %422 = vmatprep.mubr.f32.mxu0 %v284_v37 }
  0xfd   :  { %492 = vmatprep.mubr.f32.mxu1 %v286_v39  ;;  %423 = vmatmul.mubr.f32.vlgmr.msra.gmra.mxu0 %v283_v38 }
  0xfe   :  { %493 = vmatmul.mubr.f32.vlgmr.msra.gmra.mxu1 %v285_v40 }
 0x1bd   :  { %v553_v41 = vpop.f32.mrf.mxu0 }
 0x1be   :  { %v588_v42 = vpop.f32.mrf.mxu1 }
 0x1bf   :  { %v554_v44 = vpop.f32.mrf.mxu0 }
 0x1c0   :  { %v555_v45 = vadd.f32 %v554_v44, %v553_v41  ;;  %v589_v46 = vpop.f32.mrf.mxu1 }
 0x1c1   :  { %v590_v48 = vadd.f32 %v589_v46, %v588_v42 }
 0x1c2   :  { %v425_v47 = vadd.f32 %v555_v45, %v520_v43 }
 0x1c4   :  { %v495_v49 = vadd.f32 %v590_v48, %v425_v47 }
 0x1c6   :  { %499 = vst.msk [vmem:[#allocation2] sm:$0xff] %vm498_vm2, %v495_v49 }
 0x1c7   :  { %612 = shalt.err (!%p609_p4)
}
 0x1c8   :  { %509 = dma.vmem_to_hbm [thread:$0]  %s507_s19, 128, %s1056_s5, [#allocation3]  }
 0x1c9   :  { %621 = dma.done.wait [#allocation3], 128  }
 0x1ca   :  { %622 = vsyncadd [#allocation3], 4294967168 }
 0x1cb   :  { %513 = vsyncpa [#allocation3], 1 }

</bundles_post_ra>
